<compile_context>
chip_gen: v7x
topology: tpu7x:2x2x1
jax: 0.10.0
libtpu: 0.0.40
codegen_flags: <defaults>
</compile_context>

<pallas_src>
import functools

import jax
import jax.numpy as jnp
import numpy as np
from jax import lax
from jax.experimental import pallas as pl
from jax.experimental.pallas import tpu as pltpu


def _round_up(n: int, m: int) -> int:
    return ((n + m - 1) // m) * m


def _et_feature_kernel(span_ref,      # VMEM: [TB, 2] int32   (start, end)
                       x_ref,         # VMEM: [TB*S, H]       compute dtype
                       ent_ref,       # VMEM: [TB, Dp] f32    (ent@W_ent + bias)
                       w_tok_ref,     # VMEM: [H, Dp]         compute dtype
                       out_ref,       # VMEM: [TB, Dp] f32
                       *, seq_len: int):
    TB = span_ref.shape[0]
    TBS = x_ref.shape[0]                      # TB * S
    S = seq_len

    starts = span_ref[:, 0:1]                 # [TB, 1] i32
    ends = span_ref[:, 1:2]                   # [TB, 1] i32

    # Block-diagonal span mask over the flattened (TB*S) token axis.
    # Element (t, j) is 1 iff token j belongs to row t's span:
    #   t*S + clip(start_t) <= j < t*S + clip(end_t)
    col = lax.broadcasted_iota(jnp.int32, (TB, TBS), 1)     # flat token index
    row = lax.broadcasted_iota(jnp.int32, (TB, TBS), 0)     # block-row index
    base = row * S
    lo = base + jnp.clip(starts, 0, S)
    hi = base + jnp.clip(ends, 0, S)
    mask = ((col >= lo) & (col < hi)).astype(x_ref.dtype)   # [TB, TBS]

    # Span-sum pooling on the MXU (f32 accumulation).
    span_sum = jnp.dot(mask, x_ref[...],
                       preferred_element_type=jnp.float32)  # [TB, H] f32

    # Per-row 1/span_len on the EUP (approx reciprocal is effectively free).
    span_len = jnp.maximum(ends - starts, 1).astype(jnp.float32)   # [TB, 1]
    pooled = span_sum * pl.reciprocal(span_len, approx=True)       # [TB, H] f32

    # Dense projection matmul [TB, H] @ [H, Dp] (MXU) + fused entity/bias term.
    proj = jnp.dot(pooled.astype(w_tok_ref.dtype), w_tok_ref[...],
                   preferred_element_type=jnp.float32)              # [TB, Dp]
    out_ref[...] = proj + ent_ref[...]


def et_feature_extractor(x, entity_span, entity_ids, emb_table, w_tok, w_ent,
                         bias, *, batch_tile: int = 8,
                         compute_dtype=jnp.float32):
    """x: [B,S,H]; entity_span: [B,2] i32; entity_ids: [B] i32 -> [B, D] f32."""
    B, S, H = x.shape
    D = w_tok.shape[1]

    TB = max(8, min(batch_tile, _round_up(B, 8)))   # sublane-aligned batch tile
    Bp = _round_up(B, TB)                           # padded batch
    Dp = _round_up(D, 128)                          # lane-dense output stores

    # ---- wrapper-side glue: gather + tiny entity projection + padding ----
    ent_proj = (emb_table[entity_ids].astype(jnp.float32)
                @ w_ent.astype(jnp.float32)
                + jnp.reshape(bias, (1, D)).astype(jnp.float32))    # [B, D]

    x_c = x.astype(compute_dtype).reshape(B * S, H)                 # free reshape
    w_tok_c = w_tok.astype(compute_dtype)
    spans = entity_span.astype(jnp.int32)

    if Bp != B:
        x_c = jnp.pad(x_c, ((0, (Bp - B) * S), (0, 0)))
        spans = jnp.pad(spans, ((0, Bp - B), (0, 0)))
        ent_proj = jnp.pad(ent_proj, ((0, Bp - B), (0, 0)))
    if Dp != D:
        w_tok_c = jnp.pad(w_tok_c, ((0, 0), (0, Dp - D)))
        ent_proj = jnp.pad(ent_proj, ((0, 0), (0, Dp - D)))

    kernel = functools.partial(_et_feature_kernel, seq_len=S)

    grid_spec = pltpu.PrefetchScalarGridSpec(
        num_scalar_prefetch=0,
        grid=(Bp // TB,),
        in_specs=[
            pl.BlockSpec((TB, 2),     lambda g: (g, 0)),   # spans
            pl.BlockSpec((TB * S, H), lambda g: (g, 0)),   # tokens (flattened)
            pl.BlockSpec((TB, Dp),    lambda g: (g, 0)),   # ent-proj + bias
            pl.BlockSpec((H, Dp),     lambda g: (0, 0)),   # W_tok (resident)
        ],
        out_specs=pl.BlockSpec((TB, Dp), lambda g: (g, 0)),
    )

    out = pl.pallas_call(
        kernel,
        out_shape=jax.ShapeDtypeStruct((Bp, Dp), jnp.float32),
        grid_spec=grid_spec,
        compiler_params=pltpu.CompilerParams(
            dimension_semantics=("parallel",),      # batch rows independent
            vmem_limit_bytes=32 * 1024 * 1024,
        ),
    )(spans, x_c, ent_proj, w_tok_c)

    return out[:B, :D]


def _reference(x, entity_span, entity_ids, emb_table, w_tok, w_ent, bias):
    x = np.asarray(x, np.float32)
    spans = np.asarray(entity_span)
    B, S, H = x.shape
    pos = np.arange(S)[None, :]                                   # [1, S]
    start = spans[:, :1]                                          # [B, 1]
    end = spans[:, 1:]                                            # [B, 1]
    mask = ((pos >= start) & (pos < end)).astype(np.float32)      # [B, S]
    length = np.maximum(end - start, 1).astype(np.float32)        # [B, 1]
    pooled = (x * mask[:, :, None]).sum(axis=1) / length          # [B, H]
    ent = np.asarray(emb_table)[np.asarray(entity_ids)]
    return (pooled @ np.asarray(w_tok) + ent @ np.asarray(w_ent)
            + np.asarray(bias).reshape(1, -1))


if __name__ == "__main__":
    B, S, H = 16, 8, 32          # batch, seq, hidden
    E, D = 32, 32                # entity-emb dim, output feature dim
    NUM_ENTITIES = 16

    key = jax.random.PRNGKey(0)
    k_x, k_emb, k_wt, k_we, k_b, k_s, k_l, k_id = jax.random.split(key, 8)

    x = jax.random.normal(k_x, (B, S, H), dtype=jnp.float32)

    starts = jax.random.randint(k_s, (B,), 0, S - 1)
    lens = jax.random.randint(k_l, (B,), 1, 4)
    ends = jnp.minimum(starts + lens, S)
    entity_span = jnp.stack([starts, ends], axis=1).astype(jnp.int32)
    entity_ids = jax.random.randint(k_id, (B,), 0, NUM_ENTITIES).astype(jnp.int32)

    # Deterministic synthetic parameters (no checkpoint load).
    emb_table = jax.random.normal(k_emb, (NUM_ENTITIES, E), dtype=jnp.float32) * 0.1
    w_tok = jax.random.normal(k_wt, (H, D), dtype=jnp.float32) * 0.1
    w_ent = jax.random.normal(k_we, (E, D), dtype=jnp.float32) * 0.1
    bias = jax.random.normal(k_b, (1, D), dtype=jnp.float32) * 0.01

    ref = _reference(x, entity_span, entity_ids, emb_table, w_tok, w_ent, bias)

    # f32 compute path (tolerance allows the EUP approximate reciprocal).
    out_f32 = et_feature_extractor(x, entity_span, entity_ids, emb_table,
                                   w_tok, w_ent, bias,
                                   batch_tile=8, compute_dtype=jnp.float32)
    out_f32 = jax.block_until_ready(out_f32)
    np.testing.assert_allclose(np.asarray(out_f32), ref, rtol=5e-3, atol=5e-3)

    # bf16 DMA/MXU path with f32 accumulation (per perf review; looser check).
    out_bf16 = et_feature_extractor(x, entity_span, entity_ids, emb_table,
                                    w_tok, w_ent, bias,
                                    batch_tile=8, compute_dtype=jnp.bfloat16)
    out_bf16 = jax.block_until_ready(out_bf16)
    np.testing.assert_allclose(np.asarray(out_bf16), ref, rtol=5e-2, atol=5e-2)

    print("KERNEL_OK")
</pallas_src>

<mosaic_0001>
module attributes {stable_mosaic.version = 11 : i64} {
  func.func @_et_feature_kernel(%arg0: i32, %arg1: memref<8x2xi32, #tpu.memory_space<vmem>>, %arg2: memref<64x32xf32, #tpu.memory_space<vmem>>, %arg3: memref<8x128xf32, #tpu.memory_space<vmem>>, %arg4: memref<32x128xf32, #tpu.memory_space<vmem>>, %arg5: memref<8x128xf32, #tpu.memory_space<vmem>>) attributes {dimension_semantics = [#tpu.dimension_semantics<parallel>], iteration_bounds = array<i64: 2>, scalar_prefetch = 0 : i64, scratch_operands = 0 : i64, tpu.core_type = #tpu.core_type<tc>, window_params = [{transform_indices = @transform_0, window_bounds = array<i64: 8, 2>}, {transform_indices = @transform_1, window_bounds = array<i64: 64, 32>}, {transform_indices = @transform_2, window_bounds = array<i64: 8, 128>}, {pipeline_mode = #tpu.pipeline_mode<synchronous>, transform_indices = @transform_3, window_bounds = array<i64: 32, 128>}, {transform_indices = @transform_4, window_bounds = array<i64: 8, 128>}]} {
    %c0 = arith.constant 0 : index
    %c0_0 = arith.constant 0 : index
    %0 = vector.load %arg1[%c0, %c0_0] : memref<8x2xi32, #tpu.memory_space<vmem>>, vector<8x1xi32>
    %c0_1 = arith.constant 0 : index
    %c1 = arith.constant 1 : index
    %1 = vector.load %arg1[%c0_1, %c1] : memref<8x2xi32, #tpu.memory_space<vmem>>, vector<8x1xi32>
    %2 = tpu.iota {dimensions = array<i32: 1>} : vector<8x64xi32>
    %3 = tpu.iota {dimensions = array<i32: 0>} : vector<8x64xi32>
    %c8_i32 = arith.constant 8 : i32
    %4 = vector.broadcast %c8_i32 : i32 to vector<8x64xi32>
    %5 = arith.muli %3, %4 : vector<8x64xi32>
    %c0_i32 = arith.constant 0 : i32
    %c8_i32_2 = arith.constant 8 : i32
    %6 = vector.broadcast %c0_i32 : i32 to vector<8x1xi32>
    %7 = arith.maxsi %6, %0 : vector<8x1xi32>
    %8 = vector.broadcast %c8_i32_2 : i32 to vector<8x1xi32>
    %9 = arith.minsi %8, %7 : vector<8x1xi32>
    %10 = vector.broadcast %9 : vector<8x1xi32> to vector<8x64xi32>
    %11 = arith.addi %5, %10 : vector<8x64xi32>
    %c0_i32_3 = arith.constant 0 : i32
    %c8_i32_4 = arith.constant 8 : i32
    %12 = vector.broadcast %c0_i32_3 : i32 to vector<8x1xi32>
    %13 = arith.maxsi %12, %1 : vector<8x1xi32>
    %14 = vector.broadcast %c8_i32_4 : i32 to vector<8x1xi32>
    %15 = arith.minsi %14, %13 : vector<8x1xi32>
    %16 = vector.broadcast %15 : vector<8x1xi32> to vector<8x64xi32>
    %17 = arith.addi %5, %16 : vector<8x64xi32>
    %18 = arith.cmpi sge, %2, %11 : vector<8x64xi32>
    %19 = arith.cmpi slt, %2, %17 : vector<8x64xi32>
    %20 = arith.andi %18, %19 : vector<8x64xi1>
    %21 = arith.extui %20 : vector<8x64xi1> to vector<8x64xi32>
    %22 = arith.sitofp %21 : vector<8x64xi32> to vector<8x64xf32>
    %c0_5 = arith.constant 0 : index
    %c0_6 = arith.constant 0 : index
    %23 = vector.load %arg2[%c0_5, %c0_6] : memref<64x32xf32, #tpu.memory_space<vmem>>, vector<64x32xf32>
    %cst = arith.constant dense<0.000000e+00> : vector<8x32xf32>
    %24 = tpu.matmul %22, %23, %cst {dimension_numbers = #tpu.dot_dimension_numbers<[1], [0], [0], [1], [0, 0, 1, 1], [], []>} : vector<8x64xf32>, vector<64x32xf32>, vector<8x32xf32> -> vector<8x32xf32>
    %25 = arith.subi %1, %0 : vector<8x1xi32>
    %c1_i32 = arith.constant 1 : i32
    %26 = vector.broadcast %c1_i32 : i32 to vector<8x1xi32>
    %27 = arith.maxsi %25, %26 : vector<8x1xi32>
    %28 = arith.sitofp %27 : vector<8x1xi32> to vector<8x1xf32>
    %29 = tpu.reciprocal %28 {approx = true} : vector<8x1xf32> -> vector<8x1xf32>
    %30 = vector.broadcast %29 : vector<8x1xf32> to vector<8x32xf32>
    %31 = arith.mulf %24, %30 : vector<8x32xf32>
    %c0_7 = arith.constant 0 : index
    %c0_8 = arith.constant 0 : index
    %32 = vector.load %arg4[%c0_7, %c0_8] : memref<32x128xf32, #tpu.memory_space<vmem>>, vector<32x128xf32>
    %cst_9 = arith.constant dense<0.000000e+00> : vector<8x128xf32>
    %33 = tpu.matmul %31, %32, %cst_9 {dimension_numbers = #tpu.dot_dimension_numbers<[1], [0], [0], [1], [0, 0, 1, 1], [], []>} : vector<8x32xf32>, vector<32x128xf32>, vector<8x128xf32> -> vector<8x128xf32>
    %c0_10 = arith.constant 0 : index
    %c0_11 = arith.constant 0 : index
    %34 = vector.load %arg3[%c0_10, %c0_11] : memref<8x128xf32, #tpu.memory_space<vmem>>, vector<8x128xf32>
    %35 = arith.addf %33, %34 : vector<8x128xf32>
    %c0_12 = arith.constant 0 : index
    %c0_13 = arith.constant 0 : index
    %36 = vector.load %arg5[%c0_12, %c0_13] : memref<8x128xf32, #tpu.memory_space<vmem>>, vector<8x128xf32>
    tpu.vector_store %arg5[%c0_12, %c0_13], %35 {strides = array<i32>} : memref<8x128xf32, #tpu.memory_space<vmem>>, vector<8x128xf32>,
    return
  }
  func.func @transform_0(%arg0: i32) -> (i32, i32) {
    %c0_i32 = arith.constant 0 : i32
    %c0_i32_0 = arith.constant 0 : i32
    return %arg0, %c0_i32 : i32, i32
  }
  func.func @transform_1(%arg0: i32) -> (i32, i32) {
    %c0_i32 = arith.constant 0 : i32
    %c0_i32_0 = arith.constant 0 : i32
    return %arg0, %c0_i32 : i32, i32
  }
  func.func @transform_2(%arg0: i32) -> (i32, i32) {
    %c0_i32 = arith.constant 0 : i32
    %c0_i32_0 = arith.constant 0 : i32
    return %arg0, %c0_i32 : i32, i32
  }
  func.func @transform_3(%arg0: i32) -> (i32, i32) {
    %c0_i32 = arith.constant 0 : i32
    %c0_i32_0 = arith.constant 0 : i32
    %c0_i32_1 = arith.constant 0 : i32
    return %c0_i32, %c0_i32_0 : i32, i32
  }
  func.func @transform_4(%arg0: i32) -> (i32, i32) {
    %c0_i32 = arith.constant 0 : i32
    %c0_i32_0 = arith.constant 0 : i32
    return %arg0, %c0_i32 : i32, i32
  }
}

</mosaic_0001>

<bundles_post_ra>
// kernel: tpu_custom_call.1
= control target key start
LH: loop header
LB: loop body
LE: loop exit
PB: predicated region body
PF: predicated region fallthrough
CT: control target
= control target key end

     0   :  { %9 = vsyncpa [#allocation3], 0  ;;  %s877_s0 = inlined_call_operand.vmem [shape: s32[16,2], index: 0, kind: input, shape index: {}]   ;;  %s878_s1 = inlined_call_operand.vmem [shape: f32[128,32], index: 1, kind: input, shape index: {}]   ;;  %s879_s2 = inlined_call_operand.vmem [shape: f32[16,128], index: 2, kind: input, shape index: {}]   ;;  %s880_s3 = inlined_call_operand.vmem [shape: f32[32,128], index: 3, kind: input, shape index: {}]   ;;  %s881_s4 = inlined_call_operand.hbm [shape: f32[16,128], index: 4, kind: output, shape index: {}]  }
   0x1   :  { %11 = vsyncpa [#allocation3 + $0x1], 0  ;;  %s751_s15 = smov 0   ;;  %s753_s16 = smov 0  }
   0x2   :  { %s755_s17 = smov 0   ;;  %s757_s18 = smov 0  }
   0x3 LB: > { %s772_s19 = sadd.s32 4294967295, %s717_s18   ;;  %s527_s20 = sadd.s32 4294967294, %s717_s18   ;;  %s717_s18 = sphi %s757_s18, %s887_s18   ;;  %s713_s17 = sphi %s755_s17, %s886_s17   ;;  %s709_s16 = sphi %s753_s16, %s885_s16   ;;  %s705_s15 = sphi %s751_s15, %s884_s15  }
   0x4   : > { %s776_s21 = sadd.s32 1, %s717_s18   ;;  %s123_s22 = sadd.s32 1, %s713_s17 }
   0x5   : > { %s120_s23 = ssub.s32 %s717_s18, %s776_s21  ;;  %p133_p0 = scmp.ne.s32.totalorder %s713_s17, %s709_s16 }
   0x6   : > { %p121_p1 = scmp.eq.s32.totalorder %s120_s23, 0  ;;  %p134_p2 = scmp.eq.s32.totalorder %s772_s19, 1 }
   0x7   : > { %p139_p3 = scmp.ne.s32.totalorder %s709_s16, %s705_s15  ;;  %p140_p4 = scmp.eq.s32.totalorder %s527_s20, 1 }
   0x8   : > { %s787_s24 = scalar_select %p121_p1, %s713_s17, %s123_s22  }
   0x9   : > { %p789_p5 = por %p134_p2, %p133_p0  ;;  %p793_p6 = por %p140_p4, %p139_p3 }
   0xa   : > { %p530_p7 = scmp.ge.s32.totalorder %s717_s18, 1  ;;  %p184_p8 = scmp.lt.s32.totalorder %s717_s18, 3 }
   0xc   : > { %p185_p9 = pnand %p530_p7, %p184_p8 }
   0xd   : > { %p218_p10 = scmp.lt.s32.totalorder (!%p185_p9), %s772_s19, 1  ;;  %v719_v0 = vmov (!%p185_p9), 0   ;;  %v720_v1 = vmov (!%p185_p9), 0.0|0.0   ;;  %s533_s27 = sshll.u32 (!%p185_p9), %s772_s19, 3  ;;  %v721_v2 = vmov (!%p185_p9), 1   ;;  %vm723_vm2 = vmmov (!%p185_p9), 0  }
   0xe   : > { %188 = sbr.rel (%p185_p9) target bundleno = 610 (0x262), region = 36  ;;  %650 = vset.pattern.permute.xlu0 (!%p185_p9), %v719_v0  ;;  %587 = vmatprep.subr.bf16.mxu0 (!%p185_p9), %v720_v1  ;;  %p223_p11 = scmp.lt.s32.totalorder (!%p185_p9), %s533_s27, 15  ;;  %v724_v17 = vmov (!%p185_p9), 0.0   ;;  %v350_v19 = vld [vmem:[%s880_s3] sm:$0xff] (!%p185_p9)  ;;  %v351_v20 = vld [vmem:[%s880_s3 + $0x8] sm:$0xff] (!%p185_p9)  ;;  %v233_v26 = vlaneseq (!%p185_p9)  ;;  %vm263_vm6 = vcmask (!%p185_p9), 523264  }
   0xf   : > { %652 = vset.pattern.permute.xlu1 (!%p185_p9), %v721_v2  ;;  %599 = vmatprep.subr.bf16.mxu1 (!%p185_p9), %v720_v1  ;;  %s722_s7 = smov (!%p185_p9), 1   ;;  %v600_v21 = vpack.c.bf16 (!%p185_p9), %v351_v20, %v350_v19  ;;  %v352_v36 = vld [vmem:[%s880_s3 + $0x10] sm:$0xff] (!%p185_p9)  ;;  %v353_v37 = vld [vmem:[%s880_s3 + $0x18] sm:$0xff] (!%p185_p9)  ;;  %vm355_vm8 = vcmask (!%p185_p9), 261120   ;;  %s215_s5 = sand.u32 (!%p185_p9), 1, %s709_s16  }
  0x10   : > { %573 = vmatprep.mubr.msk.f32.mxu0 (!%p185_p9), %vm723_vm2, %v724_v17  ;;  %584 = vmatprep.mubr.msk.f32.mxu1 (!%p185_p9), %vm723_vm2, %v724_v17  ;;  %v236_v27 = vshrl.u32 (!%p185_p9), %v233_v26, 7  ;;  %v234_v31 = vand.u32 (!%p185_p9), 127, %v233_v26  ;;  %v603_v38 = vpack.c.bf16 (!%p185_p9), %v353_v37, %v352_v36  ;;  %s540_s10 = sshll.u32 (!%p185_p9), %s772_s19, 7 }
  0x11   : > { %601 = vmatpush3.bf16.msra.mxu1 (!%p185_p9), %v600_v21  ;;  %s835_s20 = scalar_lea.hbm (!%p185_p9), %s881_s4, %s540_s10 }
  0x12   : > { %602 = vmatprep.subr.bf16.mxu1 (!%p185_p9), %v720_v1  ;;  %v237_v29 = vmul.u32 (!%p185_p9), 8, %v236_v27 }
  0x15   : > { %s802_s28 = scalar_select %p218_p10, %s772_s19, 1  ;;  %604 = vmatpush3.bf16.msra.mxu1 %v603_v38 }
  0x16   : > { %s889_s27 = smov (!%p223_p11, %s533_s27), 15  ;;  %s725_s19 = smov [#allocation2]  }
  0x17   : > { %s532_s29 = sshll.u32 %s802_s28, 3  ;;  %s534_s8 = sshll.u32 %s889_s27, 3 }
  0x18   : > { %s221_s6 = scalar_lea.vmem %s877_s0, %s532_s29  ;;  %s226_s11 = scalar_lea.vmem %s878_s1, %s534_s8 }
  0x19   : > { %v232_v3 = vld [vmem:[%s221_s6] sm:$0xff]  ;;  %v256_v7 = vld [vmem:[%s226_s11 + $0x8] sm:$0xff]  ;;  %v257_v8 = vld [vmem:[%s226_s11 + $0x10] sm:$0xff]  ;;  %s531_s6 = sshll.u32 %s215_s5, 3  ;;  %s231_s9 = scalar_lea.vmem %s879_s2, %s532_s29 }
  0x1a   : > { %vm238_vm0 = vcmp.gt.s32.totalorder %v232_v3, 0  ;;  %337 = vrot.lane.b32.xlu1 %v232_v3, %s722_s7  ;;  %v255_v6 = vld [vmem:[%s226_s11] sm:$0xff]  ;;  %v258_v10 = vld [vmem:[%s226_s11 + $0x18] sm:$0xff]  ;;  %v260_v13 = vld [vmem:[%s226_s11 + $0x28] sm:$0xff]  ;;  %s431_s28 = scalar_lea.sflag [#allocation3], %s215_s5  ;;  %s659_s22 = sshll.u32 %s725_s19, 4  ;;  %s660_s22 = int_to_ptr.vmem [resolvable:$false] %s659_s22 }
  0x1b   : > { %v239_v4 = vsel %vm238_vm0, %v232_v3, 0  ;;  %v588_v9 = vpack.c.bf16 %v256_v7, %v255_v6  ;;  %v591_v11 = vpack.c.bf16 %v258_v10, %v257_v8  ;;  %v259_v12 = vld [vmem:[%s226_s11 + $0x20] sm:$0xff]  ;;  %v261_v15 = vld [vmem:[%s226_s11 + $0x30] sm:$0xff]  ;;  %v262_v16 = vld [vmem:[%s226_s11 + $0x38] sm:$0xff]  ;;  %s217_s11 = scalar_lea.vmem [#allocation2], %s531_s6  ;;  %s661_s23 = scalar_lea.vmem %s660_s22, 256 }
  0x1c   : > { %vm240_vm1 = vcmp.lt.s32.totalorder %v239_v4, 8  ;;  %v594_v14 = vpack.c.bf16 %v260_v13, %v259_v12  ;;  %v597_v18 = vpack.c.bf16 %v262_v16, %v261_v15  ;;  %v354_v43 = vld [vmem:[%s231_s9] sm:$0xff]  ;;  %s444_s12 = sshll.u32 %s217_s11, 4  ;;  %s837_s12 = int_to_ptr.vmem [resolvable:$true] %s444_s12 }
  0x1d   : > { %v241_v5 = vsel %vm240_vm1, %v239_v4, 8  ;;  %589 = vmatpush3.bf16.msra.mxu0 %v588_v9  ;;  %s655_s29 = scalar_lea.vmem %s837_s12, 128  ;;  %p662_p1 = scmp.lt.s32.totalorder %s837_s12, %s660_s22 }
  0x1e   : > { %243 = vperm.xlu0 %650, %v241_v5   ;;  %590 = vmatprep.subr.bf16.mxu0 %v720_v1  ;;  %p656_p12 = scmp.ne.s32.totalorder %s837_s12, %s655_s29  ;;  %p663_p2 = scmp.lt.s32.totalorder %s661_s23, %s655_s29 }
  0x20   : > { %p657_p13 = pnand %p656_p12, %p789_p5  ;;  %p664_p3 = por %p663_p2, %p662_p1 }
  0x21   : > { %592 = vmatpush3.bf16.msra.mxu0 %v591_v11 }
  0x22   : > { %651 = vset.pattern.permute.xlu0 %v721_v2  ;;  %593 = vmatprep.subr.bf16.mxu0 %v720_v1  ;;  %p658_p0 = pneg %p657_p13 }
  0x23   : > { %247 = vperm.xlu0 %651, %v241_v5  }
  0x24   : > { %p665_p4 = pnand %p664_p3, %p658_p0 }
  0x25   : > { %595 = vmatpush3.bf16.msra.mxu0 %v594_v14 }
  0x26   : > { %596 = vmatprep.subr.bf16.mxu0 %v720_v1 }
  0x29   : > { %598 = vmatpush3.bf16.msra.mxu0 %v597_v18 }
  0x8c   : > { %v338_v22 = vpop.permute.xlu1 %337 }
  0x8d   : > { %v339_v23 = vsub.s32 %v232_v3, %v338_v22 }
  0x8f   : > { %vm340_vm3 = vcmp.gt.s32.totalorder %v339_v23, 1 }
  0x90   : > { %v341_v24 = vsel %vm340_vm3, %v339_v23, 1 }
  0x91   : > { %v342_v25 = vcvt.s32.f32 %v341_v24 }
  0x93   : > { %653 = vrcp.f32 %v342_v25 }
  0x9d   : > { %v654_v28 = vpop.eup %653  ;;  %v244_v30 = vpop.permute.xlu0 %243 }
  0x9e   : > { %346 = vperm.xlu1 %652, %v654_v28   ;;  %v245_v32 = vadd.s32 %v244_v30, %v237_v29 }
  0xa0   : > { %vm250_vm4 = vcmp.ge.s32.totalorder %v234_v31, %v245_v32 }
  0xa2   : > { %v248_v33 = vpop.permute.xlu0 %247 }
  0xa3   : > { %v249_v34 = vadd.s32 %v248_v33, %v237_v29 }
  0xa5   : > { %vm251_vm5 = vcmp.lt.s32.totalorder %v234_v31, %v249_v34 }
  0xa6   : > { %vm252_vm7 = vmand %vm250_vm4, %vm251_vm5 }
  0xa7   : > { %v536_v35 = vsel %vm252_vm7, 1.0, %v724_v17 }
  0xa8   : > { %574 = vmatmul.mubr.msk.f32.vlgmr.msra.gmra.mrb[0].mxu0 %vm263_vm6, %v536_v35 }
 0x11d   : > { %v347_v39 = vpop.permute.xlu1 %346 }
 0x17b   : > { %v333_v40 = vpop.f32.mrb[0].mxu0 }
 0x17c   : > { %v349_v41 = vmul.f32 %v347_v39, %v333_v40  ;;  %v575_v42 = vpop.f32.mrb[1].mxu0 }
 0x17e   : > { %585 = vmatmul.mubr.msk.f32.vlgmr.msra.gmra.mrb[0].mxu1 %vm355_vm8, %v349_v41 }
 0x251   : > { %v425_v44 = vpop.f32.mrb[0].mxu1 }
 0x252   : > { %v426_v45 = vadd.f32 %v425_v44, %v354_v43  ;;  %v586_v46 = vpop.f32.mrb[1].mxu1 }
 0x254   : > { %429 = vst [vmem:[%s217_s11] sm:$0xff] %v426_v45 }
 0x255   : > { %668 = shalt.err (!%p665_p4)
}
 0x256   : > { %s669_s27 = scalar_lea.hbm %s835_s20, 128  ;;  %s673_s6 = scalar_lea.hbm %s881_s4, 256 }
 0x257   : > { %p670_p7 = scmp.ne.s32.totalorder %s835_s20, %s669_s27  ;;  %p674_p10 = scmp.lt.u32.totalorder %s835_s20, %s881_s4 }
 0x258   : > { %p675_p11 = scmp.lt.u32.totalorder %s673_s6, %s669_s27  ;;  %p677_p13 = scmp.lt.u32.totalorder %s669_s27, %s835_s20 }
 0x259   : > { %p671_p8 = pnand %p670_p7, %p789_p5 }
 0x25a   : > { %p676_p12 = por %p675_p11, %p674_p10 }
 0x25b   : > { %p672_p9 = pneg %p671_p8 }
 0x25c   : > { %p678_p0 = por %p677_p13, %p676_p12 }
 0x25e   : > { %p679_p1 = pnand %p678_p0, %p672_p9 }
 0x260   : > { %682 = shalt.err (!%p679_p1)
}
 0x261   : > { %605 = dma.vmem_to_hbm [thread:$0]  (%p789_p5), %s837_s12, 128, %s835_s20, %s431_s28  }
 0x262 PF: > { %p611_p2 = scmp.ge.s32.totalorder %s717_s18, 2  ;;  %s456_s9 = sand.u32 1, %s705_s15  }
 0x263   : > { %s457_s10 = scalar_lea.sflag [#allocation3], %s456_s9 }
 0x264   : > { %p608_p3 = pnand %p611_p2, %p793_p6 }
 0x266   : > { %700 = dma.done.wait (!%p608_p3), %s457_s10, 128  }
 0x267   : > { %702 = vsyncadd (!%p608_p3), %s457_s10, 4294967168  ;;  %p14_p4 = scmp.ge.s32.totalorder %s776_s21, 4   ;;  %s884_s15 = smov %s709_s16 }
 0x268   : > { %s885_s16 = smov %s713_s17  ;;  %s886_s17 = smov %s787_s24 }
 0x269   : > { %s887_s18 = smov %s776_s21  ;;  %16 = sbr.rel (!%p14_p4) target bundleno = 3 (0x3), region = 77 }
 0x270   :  { %462 = vsyncpa [#allocation3], 1 }
 0x271   :  { %464 = vsyncpa [#allocation3 + $0x1], 1 }

</bundles_post_ra>
